<compile_context>
chip_gen: v7x
topology: tpu7x:2x2x1
jax: 0.10.0
libtpu: 0.0.40
codegen_flags: <defaults>
</compile_context>

<pallas_src>
import math

import jax
import jax.numpy as jnp
from jax.experimental import pallas as pl
from jax.experimental.pallas import tpu as pltpu


def _affine_kernel(w_ref, b_ref, x_ref, o_ref):
    # w_ref, b_ref: SMEM scalars of shape (1,)
    # x_ref, o_ref: VMEM tiles of shape (tm, lanes)
    w = w_ref[0]
    b = b_ref[0]
    o_ref[...] = (w * x_ref[...] + b).astype(o_ref.dtype)


def _device_params():
    """(target block bytes, tensorcores per chip) from the detected TPU generation."""
    try:
        kind = jax.devices()[0].device_kind.lower()
    except Exception:
        kind = ""
    if "v5" in kind:
        return 2 * 1024 * 1024, 1   # v5e: ~820 GB/s HBM, 1 TC -> 2 MiB tiles suffice
    if "v6" in kind:
        return 4 * 1024 * 1024, 1   # v6e: 128 MiB VMEM, 1 TC -> larger tiles are free headroom
    # v7x (2 TCs, ~3.2 TB/s HBM) and unknown chips: bigger tiles, assume 2 cores.
    return 4 * 1024 * 1024, 2


def _sublanes_for(itemsize: int) -> int:
    # Packed sublane count: f32 -> 8, bf16/f16 -> 16, int8/fp8 -> 32.
    return max(8, 32 // max(itemsize, 1))


def _choose_lanes(total: int):
    """Widest lane-dense width that divides `total` exactly (no pad); else pad to 1024."""
    for lanes in (1024, 512, 256, 128):
        if total % lanes == 0:
            return lanes, False
    return 1024, True


def _choose_tile_rows(rows: int, lanes: int, itemsize: int,
                      block_bytes: int, num_cores: int) -> int:
    sub = _sublanes_for(itemsize)
    tm = max(sub, (block_bytes // (lanes * itemsize)) // sub * sub)
    if num_cores > 1:
        # >=2 grid steps per TensorCore so each core's pipeline overlaps DMA/compute,
        # but only when there is enough sublane-aligned work to split.
        min_steps = 2 * num_cores
        if pl.cdiv(rows, tm) < min_steps and rows >= min_steps * sub:
            tm = ((pl.cdiv(rows, min_steps) + sub - 1) // sub) * sub
    if tm >= rows:
        tm = rows  # single full-extent block: block_shape == array dims is always legal
    return tm


def linear_regression_v1(x: jax.Array, weight: jax.Array, bias: jax.Array) -> jax.Array:
    """y = weight * x + bias, weight/bias are shape-(1,) parameters. Works for any x shape."""
    orig_shape = x.shape
    out_dtype = jnp.result_type(x.dtype, weight.dtype, bias.dtype)
    total = math.prod(orig_shape) if orig_shape else 1
    in_itemsize = jnp.dtype(x.dtype).itemsize
    out_itemsize = jnp.dtype(out_dtype).itemsize

    block_bytes, num_cores = _device_params()
    lanes, needs_pad = _choose_lanes(total)

    flat = x.reshape(-1)
    if needs_pad:
        padded_total = ((total + lanes - 1) // lanes) * lanes
        flat = jnp.pad(flat, (0, padded_total - total))
    else:
        padded_total = total
    rows = padded_total // lanes
    x2d = flat.reshape(rows, lanes)

    tm = _choose_tile_rows(rows, lanes, max(in_itemsize, out_itemsize),
                           block_bytes, num_cores)
    grid = (pl.cdiv(rows, tm),)

    # 2 double-buffered streamed arrays (x in, y out) + headroom; fits every generation.
    block_buf_bytes = tm * lanes * (in_itemsize + out_itemsize)
    vmem_limit = min(64 * 1024 * 1024,
                     max(16 * 1024 * 1024, 2 * block_buf_bytes + 4 * 1024 * 1024))

    cost = pl.CostEstimate(
        flops=2 * padded_total,
        transcendentals=0,
        bytes_accessed=padded_total * (in_itemsize + out_itemsize),
    )

    y2d = pl.pallas_call(
        _affine_kernel,
        out_shape=jax.ShapeDtypeStruct((rows, lanes), out_dtype),
        grid_spec=pltpu.PrefetchScalarGridSpec(
            num_scalar_prefetch=0,
            grid=grid,
            in_specs=[
                pl.BlockSpec(memory_space=pltpu.SMEM),        # weight (1,)
                pl.BlockSpec(memory_space=pltpu.SMEM),        # bias   (1,)
                pl.BlockSpec((tm, lanes), lambda i: (i, 0)),  # x tile
            ],
            out_specs=pl.BlockSpec((tm, lanes), lambda i: (i, 0)),
        ),
        compiler_params=pltpu.CompilerParams(
            dimension_semantics=("parallel",),
            vmem_limit_bytes=vmem_limit,
        ),
        cost_estimate=cost,
    )(weight.reshape(-1), bias.reshape(-1), x2d)

    if needs_pad:
        return y2d.reshape(-1)[:total].reshape(orig_shape)
    return y2d.reshape(orig_shape)


if __name__ == "__main__":
    key = jax.random.PRNGKey(0)
    kx, kw, kb = jax.random.split(key, 3)

    # Small example input: N=32 samples, D=128 features. 32*128 = 4096 elements is a
    # multiple of 1024, so this exercises the zero-copy (no-pad) fast path.
    x = jax.random.normal(kx, (32, 128), dtype=jnp.float32)

    # Parameter shapes matching nn.Parameter(torch.randn(1)).
    weight = jax.random.normal(kw, (1,), dtype=jnp.float32)
    bias = jax.random.normal(kb, (1,), dtype=jnp.float32)

    y = linear_regression_v1(x, weight, bias)
    y = jax.block_until_ready(y)

    # Correctness check against pure-JAX reference.
    y_ref = weight * x + bias
    assert y.shape == x.shape and y.dtype == y_ref.dtype
    assert jnp.allclose(y, y_ref, atol=1e-6), "mismatch vs reference"

    # Also exercise a ragged (pad-path) shape once for coverage.
    x2 = jax.random.normal(kx, (5, 7, 9), dtype=jnp.float32)
    y2 = jax.block_until_ready(linear_regression_v1(x2, weight, bias))
    assert jnp.allclose(y2, weight * x2 + bias, atol=1e-6), "mismatch vs reference (ragged)"

    print("KERNEL_OK")
</pallas_src>

<mosaic_0001>
module attributes {stable_mosaic.version = 11 : i64} {
  func.func @_affine_kernel(%arg0: i32, %arg1: memref<1xf32, #tpu.memory_space<smem>>, %arg2: memref<1xf32, #tpu.memory_space<smem>>, %arg3: memref<4x1024xf32, #tpu.memory_space<vmem>>, %arg4: memref<4x1024xf32, #tpu.memory_space<vmem>>) attributes {dimension_semantics = [#tpu.dimension_semantics<parallel>], iteration_bounds = array<i64: 1>, scalar_prefetch = 0 : i64, scratch_operands = 0 : i64, tpu.core_type = #tpu.core_type<tc>, window_params = [{transform_indices = @transform_0, window_bounds = array<i64: 1>}, {transform_indices = @transform_1, window_bounds = array<i64: 1>}, {transform_indices = @transform_2, window_bounds = array<i64: 4, 1024>}, {transform_indices = @transform_3, window_bounds = array<i64: 4, 1024>}]} {
    %c0 = arith.constant 0 : index
    %0 = memref.load %arg1[%c0] : memref<1xf32, #tpu.memory_space<smem>>
    %c0_0 = arith.constant 0 : index
    %1 = memref.load %arg2[%c0_0] : memref<1xf32, #tpu.memory_space<smem>>
    %c0_1 = arith.constant 0 : index
    %c0_2 = arith.constant 0 : index
    %2 = vector.load %arg3[%c0_1, %c0_2] : memref<4x1024xf32, #tpu.memory_space<vmem>>, vector<4x1024xf32>
    %3 = vector.broadcast %0 : f32 to vector<4x1024xf32>
    %4 = arith.mulf %3, %2 : vector<4x1024xf32>
    %5 = vector.broadcast %1 : f32 to vector<4x1024xf32>
    %6 = arith.addf %4, %5 : vector<4x1024xf32>
    %c0_3 = arith.constant 0 : index
    %c0_4 = arith.constant 0 : index
    %7 = vector.load %arg4[%c0_3, %c0_4] : memref<4x1024xf32, #tpu.memory_space<vmem>>, vector<4x1024xf32>
    tpu.vector_store %arg4[%c0_3, %c0_4], %6 {strides = array<i32>} : memref<4x1024xf32, #tpu.memory_space<vmem>>, vector<4x1024xf32>,
    return
  }
  func.func @transform_0(%arg0: i32) -> i32 {
    %c0_i32 = arith.constant 0 : i32
    %c0_i32_0 = arith.constant 0 : i32
    return %c0_i32 : i32
  }
  func.func @transform_1(%arg0: i32) -> i32 {
    %c0_i32 = arith.constant 0 : i32
    %c0_i32_0 = arith.constant 0 : i32
    return %c0_i32 : i32
  }
  func.func @transform_2(%arg0: i32) -> (i32, i32) {
    %c0_i32 = arith.constant 0 : i32
    %c0_i32_0 = arith.constant 0 : i32
    return %arg0, %c0_i32 : i32, i32
  }
  func.func @transform_3(%arg0: i32) -> (i32, i32) {
    %c0_i32 = arith.constant 0 : i32
    %c0_i32_0 = arith.constant 0 : i32
    return %arg0, %c0_i32 : i32, i32
  }
}

</mosaic_0001>

<bundles_post_ra>
// kernel: tpu_custom_call.1
= control target key start
LH: loop header
LB: loop body
LE: loop exit
PB: predicated region body
PF: predicated region fallthrough
CT: control target
= control target key end

     0   :  { %10 = vsyncpa [#allocation5], 0  ;;  %s166_s0 = inlined_call_operand.<no memory space> [shape: f32[1], index: 0, kind: input, shape index: {}]   ;;  %s167_s1 = inlined_call_operand.<no memory space> [shape: f32[1], index: 1, kind: input, shape index: {}]   ;;  %s168_s2 = inlined_call_operand.hbm [shape: f32[4,1024], index: 2, kind: input, shape index: {}]   ;;  %s169_s3 = inlined_call_operand.hbm [shape: f32[4,1024], index: 3, kind: output, shape index: {}]  }
   0x1   :  { %11 = vsyncpa [#allocation6], 0  ;;  %s114_s12 = smov [#allocation4]   ;;  %s66_s16 = scalar_lea.hbm %s168_s2, 512 }
   0x2   :  { %s22_s13 = sshll.u32 %s114_s12, 4  ;;  %p67_p0 = scmp.ne.s32.totalorder %s168_s2, %s66_s16  ;;  %s23_s13 = int_to_ptr.vmem [resolvable:$true] %s22_s13 }
   0x3   :  { %p70_p1 = scmp.lt.u32.totalorder %s66_s16, %s168_s2 }
   0x5   :  { %p72_p2 = pnand %p70_p1, %p67_p0 }
   0x7   :  { %75 = shalt.err (!%p72_p2)
}
   0x8   :  { %s76_s21 = scalar_lea.vmem %s23_s13, 512  ;;  %p81_p4 = scmp.lt.s32.totalorder %s23_s13, %s23_s13 }
   0x9   :  { %p77_p3 = scmp.ne.s32.totalorder %s23_s13, %s76_s21  ;;  %p82_p5 = scmp.lt.s32.totalorder %s76_s21, %s76_s21 }
   0xb   :  { %p83_p6 = por %p82_p5, %p81_p4 }
   0xd   :  { %p84_p7 = pnand %p83_p6, %p77_p3 }
   0xf   :  { %87 = shalt.err (!%p84_p7)
}
  0x10   :  { %25 = dma.hbm_to_vmem [thread:$0]  %s168_s2, 512, %s23_s13, [#allocation5]  }
  0x11   :  { %110 = dma.done.wait [#allocation5], 512  }
  0x12   :  { %111 = vsyncadd [#allocation5], 4294966784  ;;  %v35_v0 = vstv %s166_s0  ;;  %v31_v1 = vld [vmem:[#allocation4] sm:$0xff]  ;;  %v40_v2 = vstv %s167_s1  ;;  %v32_v3 = vld [vmem:[#allocation4 + $0x8] sm:$0xff]  ;;  %s115_s28 = smov [#allocation7]  }
  0x13   :  { %v33_v4 = vld [vmem:[#allocation4 + $0x10] sm:$0xff]  ;;  %v36_v5 = vmul.f32 %v35_v0, %v31_v1  ;;  %v37_v6 = vmul.f32 %v35_v0, %v32_v3  ;;  %v34_v8 = vld [vmem:[#allocation4 + $0x18] sm:$0xff]  ;;  %s55_s29 = sshll.u32 %s115_s28, 4  ;;  %s56_s29 = int_to_ptr.vmem [resolvable:$true] %s55_s29 }
  0x14   :  { %v38_v7 = vmul.f32 %v35_v0, %v33_v4  ;;  %v39_v9 = vmul.f32 %v35_v0, %v34_v8  ;;  %s88_s0 = scalar_lea.vmem %s56_s29, 512  ;;  %p93_p9 = scmp.lt.s32.totalorder %s56_s29, %s56_s29 }
  0x15   :  { %v41_v10 = vadd.f32 %v40_v2, %v36_v5  ;;  %v42_v11 = vadd.f32 %v40_v2, %v37_v6  ;;  %p89_p8 = scmp.ne.s32.totalorder %s56_s29, %s88_s0  ;;  %p94_p10 = scmp.lt.s32.totalorder %s88_s0, %s88_s0 }
  0x16   :  { %v43_v12 = vadd.f32 %v40_v2, %v38_v7  ;;  %v44_v13 = vadd.f32 %v40_v2, %v39_v9 }
  0x17   :  { %45 = vst [vmem:[#allocation7] sm:$0xff] %v41_v10  ;;  %46 = vst [vmem:[#allocation7 + $0x8] sm:$0xff] %v42_v11  ;;  %p95_p11 = por %p94_p10, %p93_p9 }
  0x18   :  { %47 = vst [vmem:[#allocation7 + $0x10] sm:$0xff] %v43_v12  ;;  %48 = vst [vmem:[#allocation7 + $0x18] sm:$0xff] %v44_v13 }
  0x19   :  { %p96_p12 = pnand %p95_p11, %p89_p8 }
  0x1b   :  { %99 = shalt.err (!%p96_p12)
}
  0x1c   :  { %s100_s30 = scalar_lea.hbm %s169_s3, 512 }
  0x1d   :  { %p101_p13 = scmp.ne.s32.totalorder %s169_s3, %s100_s30  ;;  %p104_p0 = scmp.lt.u32.totalorder %s100_s30, %s169_s3 }
  0x1f   :  { %p106_p1 = pnand %p104_p0, %p101_p13 }
  0x21   :  { %109 = shalt.err (!%p106_p1)
}
  0x22   :  { %58 = dma.vmem_to_hbm [thread:$0]  %s56_s29, 512, %s169_s3, [#allocation6]  }
  0x23   :  { %112 = dma.done.wait [#allocation6], 512  }
  0x24   :  { %113 = vsyncadd [#allocation6], 4294966784 }
  0x25   :  { %62 = vsyncpa [#allocation5], 1 }
  0x26   :  { %63 = vsyncpa [#allocation6], 1 }

</bundles_post_ra>
